<compile_context>
chip_gen: v7x
topology: tpu7x:2x2x1
jax: 0.10.0
libtpu: 0.0.40
codegen_flags: <defaults>
</compile_context>

<pallas_src>
import functools
import math

import jax
import jax.numpy as jnp
from jax.experimental import pallas as pl
from jax.experimental.pallas import tpu as pltpu


def _round_up(x, m):
    return ((x + m - 1) // m) * m


def _sublane(dtype):
    # Min second-to-last tile dim per dtype (sub-32-bit packs along sublanes).
    return {4: 8, 2: 16, 1: 32}.get(jnp.dtype(dtype).itemsize, 8)


def _vmem_budget():
    """Returns (scratch budget, vmem_limit_bytes) tuned per TPU generation."""
    try:
        cap = int(pltpu.get_tpu_info().vmem_capacity_bytes)
    except Exception:
        cap = None
    if cap is not None and cap >= 100 * 2**20:      # v5e / v6e: 128 MiB VMEM
        return 96 * 2**20, 110 * 2**20
    return 28 * 2**20, 48 * 2**20                   # v7x (64 MiB) or unknown


def _pick_tm(batch, row_bytes, fixed_bytes, budget, sublane, max_tm=512):
    """Largest sublane-aligned batch tile fitting the VMEM budget."""
    avail = max(budget - fixed_bytes, 2 * row_bytes * sublane)
    tm = min(max_tm, avail // (2 * row_bytes))      # x + out tiles, double-buffered
    tm = max((tm // sublane) * sublane, sublane)
    pb0 = _round_up(batch, sublane)
    tm = min(tm, pb0)
    # Prefer >=2 grid steps along the parallel batch axis so v7x's two
    # TensorCores both get work (negligible extra cost on 1-TC v5e/v6e).
    if tm >= pb0 and pb0 >= 2 * sublane:
        tm = _round_up((pb0 + 1) // 2, sublane)
    return tm


def _fused_kernel(x_ref, w_ref, b_ref, o_ref):
    # x_ref: (tm, G*din)  w_ref: (G*din, G*dout) block-diag  b_ref: (1, G*dout)
    acc = jnp.dot(x_ref[...], w_ref[...], preferred_element_type=jnp.float32)
    acc = acc + b_ref[...].astype(jnp.float32)      # single broadcast bias add
    o_ref[...] = acc.astype(o_ref.dtype)            # single lane-dense store


def _grouped_kernel(x_ref, w_ref, b_ref, o_ref, *, gt, din, dout):
    # x_ref: (tm, gt*din)  w_ref: (gt, din, dout)  b_ref/o_ref: (1/tm, gt*dout)
    parts = []
    for j in range(gt):                             # static unroll; gt kept small
        xg = x_ref[:, j * din:(j + 1) * din]
        parts.append(jnp.dot(xg, w_ref[j], preferred_element_type=jnp.float32))
    acc = parts[0] if gt == 1 else jnp.concatenate(parts, axis=-1)
    acc = acc + b_ref[...].astype(jnp.float32)      # bias hoisted: one add
    o_ref[...] = acc.astype(o_ref.dtype)            # single lane-dense store
    # TODO(synk): for very large gt, move groups fully into the grid (or use a
    # fori_loop) to bound vreg live ranges instead of the static unroll.


def group_linear_layer(x, w, b, *, compute_dtype=None, fuse_limit=512):
    """x: (batch, G, din), w: (G, din, dout), b: (1, G, dout) -> (batch, G, dout)."""
    batch, G, din = x.shape
    dout = w.shape[-1]
    out_dtype = x.dtype

    # Optional low-precision MXU feed (e.g. jnp.bfloat16 on v5e/v6e/v7x);
    # accumulation stays f32 via preferred_element_type either way.
    if compute_dtype is not None:
        x = x.astype(compute_dtype)
        w = w.astype(compute_dtype)
    itemsize = jnp.dtype(x.dtype).itemsize
    sublane = _sublane(x.dtype)
    budget, vmem_limit = _vmem_budget()

    # Free, contiguous views (no HBM transposes / copies).
    x2 = x.reshape(batch, G * din)
    b2 = b.reshape(1, G * dout)

    fused = (G * din <= fuse_limit) and (G * dout <= fuse_limit)

    if fused:
        # Block-diagonal weight: one (tm, G*din) @ (G*din, G*dout) MXU pass per
        # tile replaces G tiny lane-misaligned matmuls and masked stores.
        eye = jnp.eye(G, dtype=w.dtype)
        wbd = (w[:, :, None, :] * eye[:, None, :, None]).reshape(G * din, G * dout)

        fixed = 2 * (G * din * G * dout + G * dout) * itemsize
        row_bytes = G * (din + dout) * itemsize
        tm = _pick_tm(batch, row_bytes, fixed, budget, sublane)
        padded_batch = _round_up(batch, tm)
        if padded_batch != batch:
            x2 = jnp.pad(x2, ((0, padded_batch - batch), (0, 0)))

        out2 = pl.pallas_call(
            _fused_kernel,
            out_shape=jax.ShapeDtypeStruct((padded_batch, G * dout), out_dtype),
            grid_spec=pltpu.PrefetchScalarGridSpec(
                num_scalar_prefetch=0,
                grid=(padded_batch // tm,),
                in_specs=[
                    pl.BlockSpec((tm, G * din), lambda i: (i, 0)),
                    # Constant block index -> fetched once, stays VMEM resident.
                    # TODO(synk): pipeline_mode=pl.Buffered(1) on these constant
                    # blocks once single-buffering is verified on the target jax.
                    pl.BlockSpec((G * din, G * dout), lambda i: (0, 0)),
                    pl.BlockSpec((1, G * dout), lambda i: (0, 0)),
                ],
                out_specs=pl.BlockSpec((tm, G * dout), lambda i: (i, 0)),
            ),
            compiler_params=pltpu.CompilerParams(
                dimension_semantics=("parallel",),
                vmem_limit_bytes=vmem_limit,
            ),
        )(x2, wbd, b2)
    else:
        # Per-group path.  Stream weights by tiling the group axis when din and
        # dout are lane-aligned; otherwise keep all groups in one grid step.
        gt = G
        if G > 1 and din % 128 == 0 and dout % 128 == 0:
            while gt > 1 and 2 * gt * (din * dout + dout) * itemsize > budget // 2:
                gt -= 1
                while G % gt:
                    gt -= 1
        # TODO(synk): add din (K) / dout (N) grid tiling with an f32 VMEM
        # accumulator for single groups whose weights exceed the VMEM budget.

        fixed = 2 * gt * (din * dout + dout) * itemsize
        row_bytes = gt * (din + dout) * itemsize
        tm = _pick_tm(batch, row_bytes, fixed, budget, sublane)
        padded_batch = _round_up(batch, tm)
        if padded_batch != batch:
            x2 = jnp.pad(x2, ((0, padded_batch - batch), (0, 0)))

        kernel = functools.partial(_grouped_kernel, gt=gt, din=din, dout=dout)
        out2 = pl.pallas_call(
            kernel,
            out_shape=jax.ShapeDtypeStruct((padded_batch, G * dout), out_dtype),
            grid_spec=pltpu.PrefetchScalarGridSpec(
                num_scalar_prefetch=0,
                # Group tile outer, batch tile inner: the weight block index is
                # unchanged across consecutive steps, so it is not re-DMA'd.
                grid=(G // gt, padded_batch // tm),
                in_specs=[
                    pl.BlockSpec((tm, gt * din), lambda g, i: (i, g)),
                    pl.BlockSpec((gt, din, dout), lambda g, i: (g, 0, 0)),
                    pl.BlockSpec((1, gt * dout), lambda g, i: (0, g)),
                ],
                out_specs=pl.BlockSpec((tm, gt * dout), lambda g, i: (i, g)),
            ),
            compiler_params=pltpu.CompilerParams(
                dimension_semantics=("parallel", "parallel"),
                vmem_limit_bytes=vmem_limit,
            ),
        )(x2, w, b2)

    return out2[:batch].reshape(batch, G, dout)


def init_params(key, num_blocks, din, dout, dtype=jnp.float32):
    """Matches reset_parameters(): U(-1/sqrt(din), 1/sqrt(din)) for w and b."""
    bound = math.sqrt(1.0 / din)
    kw, kb = jax.random.split(key)
    w = jax.random.uniform(kw, (num_blocks, din, dout), dtype, -bound, bound)
    b = jax.random.uniform(kb, (1, num_blocks, dout), dtype, -bound, bound)
    return w, b


if __name__ == "__main__":
    key = jax.random.PRNGKey(0)

    # Small per-group dims: exercises the fused block-diagonal path.
    batch, num_blocks, din, dout = 8, 4, 32, 32
    kx, kp, key = jax.random.split(key, 3)
    x = jax.random.normal(kx, (batch, num_blocks, din), jnp.float32)
    w, b = init_params(kp, num_blocks, din, dout)
    out = jax.block_until_ready(group_linear_layer(x, w, b))
    ref = jnp.einsum("bgd,gde->bge", x, w) + b
    assert out.shape == (batch, num_blocks, dout)
    assert jnp.allclose(out, ref, atol=1e-5, rtol=1e-5)

    # Larger per-group dims: exercises the grouped, lane-dense-store path.
    batch2, nb2, din2, dout2 = 24, 2, 320, 128
    kx2, kp2 = jax.random.split(key)
    xb = jax.random.normal(kx2, (batch2, nb2, din2), jnp.float32)
    wb, bb = init_params(kp2, nb2, din2, dout2)
    outb = jax.block_until_ready(group_linear_layer(xb, wb, bb))
    refb = jnp.einsum("bgd,gde->bge", xb, wb) + bb
    assert outb.shape == (batch2, nb2, dout2)
    assert jnp.allclose(outb, refb, atol=1e-5, rtol=1e-5)

    print("KERNEL_OK")
</pallas_src>

<mosaic_0001>
module attributes {stable_mosaic.version = 11 : i64} {
  func.func @_fused_kernel(%arg0: i32, %arg1: memref<8x128xf32, #tpu.memory_space<vmem>>, %arg2: memref<128x128xf32, #tpu.memory_space<vmem>>, %arg3: memref<1x128xf32, #tpu.memory_space<vmem>>, %arg4: memref<8x128xf32, #tpu.memory_space<vmem>>) attributes {dimension_semantics = [#tpu.dimension_semantics<parallel>], iteration_bounds = array<i64: 1>, scalar_prefetch = 0 : i64, scratch_operands = 0 : i64, tpu.core_type = #tpu.core_type<tc>, window_params = [{transform_indices = @transform_0, window_bounds = array<i64: 8, 128>}, {pipeline_mode = #tpu.pipeline_mode<synchronous>, transform_indices = @transform_1, window_bounds = array<i64: 128, 128>}, {pipeline_mode = #tpu.pipeline_mode<synchronous>, transform_indices = @transform_2, window_bounds = array<i64: 1, 128>}, {transform_indices = @transform_3, window_bounds = array<i64: 8, 128>}]} {
    %c0 = arith.constant 0 : index
    %c0_0 = arith.constant 0 : index
    %0 = vector.load %arg1[%c0, %c0_0] : memref<8x128xf32, #tpu.memory_space<vmem>>, vector<8x128xf32>
    %c0_1 = arith.constant 0 : index
    %c0_2 = arith.constant 0 : index
    %1 = vector.load %arg2[%c0_1, %c0_2] : memref<128x128xf32, #tpu.memory_space<vmem>>, vector<128x128xf32>
    %cst = arith.constant dense<0.000000e+00> : vector<8x128xf32>
    %2 = tpu.matmul %0, %1, %cst {dimension_numbers = #tpu.dot_dimension_numbers<[1], [0], [0], [1], [0, 0, 1, 1], [], []>} : vector<8x128xf32>, vector<128x128xf32>, vector<8x128xf32> -> vector<8x128xf32>
    %c0_3 = arith.constant 0 : index
    %c0_4 = arith.constant 0 : index
    %3 = vector.load %arg3[%c0_3, %c0_4] : memref<1x128xf32, #tpu.memory_space<vmem>>, vector<1x128xf32>
    %4 = vector.broadcast %3 : vector<1x128xf32> to vector<8x128xf32>
    %5 = arith.addf %2, %4 : vector<8x128xf32>
    %c0_5 = arith.constant 0 : index
    %c0_6 = arith.constant 0 : index
    %6 = vector.load %arg4[%c0_5, %c0_6] : memref<8x128xf32, #tpu.memory_space<vmem>>, vector<8x128xf32>
    tpu.vector_store %arg4[%c0_5, %c0_6], %5 {strides = array<i32>} : memref<8x128xf32, #tpu.memory_space<vmem>>, vector<8x128xf32>,
    return
  }
  func.func @transform_0(%arg0: i32) -> (i32, i32) {
    %c0_i32 = arith.constant 0 : i32
    %c0_i32_0 = arith.constant 0 : i32
    return %arg0, %c0_i32 : i32, i32
  }
  func.func @transform_1(%arg0: i32) -> (i32, i32) {
    %c0_i32 = arith.constant 0 : i32
    %c0_i32_0 = arith.constant 0 : i32
    %c0_i32_1 = arith.constant 0 : i32
    return %c0_i32, %c0_i32_0 : i32, i32
  }
  func.func @transform_2(%arg0: i32) -> (i32, i32) {
    %c0_i32 = arith.constant 0 : i32
    %c0_i32_0 = arith.constant 0 : i32
    %c0_i32_1 = arith.constant 0 : i32
    return %c0_i32, %c0_i32_0 : i32, i32
  }
  func.func @transform_3(%arg0: i32) -> (i32, i32) {
    %c0_i32 = arith.constant 0 : i32
    %c0_i32_0 = arith.constant 0 : i32
    return %arg0, %c0_i32 : i32, i32
  }
}

</mosaic_0001>

<bundles_post_ra>
// kernel: tpu_custom_call.1
= control target key start
LH: loop header
LB: loop body
LE: loop exit
PB: predicated region body
PF: predicated region fallthrough
CT: control target
= control target key end

     0   :  { %8 = vsyncpa [#allocation3], 0  ;;  %s383_s0 = inlined_call_operand.hbm [shape: f32[8,128], index: 0, kind: input, shape index: {}]   ;;  %s384_s1 = inlined_call_operand.hbm [shape: f32[128,128], index: 1, kind: input, shape index: {}]   ;;  %s385_s2 = inlined_call_operand.vmem [shape: f32[1,128], index: 2, kind: input, shape index: {}]   ;;  %s386_s3 = inlined_call_operand.hbm [shape: f32[8,128], index: 3, kind: output, shape index: {}]  }
   0x1   :  { %9 = vsyncpa [#allocation6], 0 }
   0x2   :  { %10 = vsyncpa [#allocation4], 0  ;;  %s309_s12 = smov [#allocation2]   ;;  %s310_s14 = smov [#allocation5]  }
   0x3   :  { %s17_s13 = sshll.u32 %s309_s12, 4  ;;  %s26_s15 = sshll.u32 %s310_s14, 4  ;;  %s18_s13 = int_to_ptr.vmem [resolvable:$true] %s17_s13  ;;  %s337_s15 = int_to_ptr.vmem [resolvable:$true] %s26_s15 }
   0x4   :  { %s237_s18 = scalar_lea.hbm %s383_s0, 128 }
   0x5   :  { %p238_p0 = scmp.ne.s32.totalorder %s383_s0, %s237_s18  ;;  %p241_p1 = scmp.lt.u32.totalorder %s237_s18, %s383_s0 }
   0x7   :  { %p243_p2 = pnand %p241_p1, %p238_p0 }
   0x9   :  { %246 = shalt.err (!%p243_p2)
}
   0xa   :  { %s247_s23 = scalar_lea.vmem %s18_s13, 128  ;;  %p252_p4 = scmp.lt.s32.totalorder %s18_s13, %s18_s13 }
   0xb   :  { %p248_p3 = scmp.ne.s32.totalorder %s18_s13, %s247_s23  ;;  %p253_p5 = scmp.lt.s32.totalorder %s247_s23, %s247_s23 }
   0xd   :  { %p254_p6 = por %p253_p5, %p252_p4 }
   0xf   :  { %p255_p7 = pnand %p254_p6, %p248_p3 }
  0x11   :  { %258 = shalt.err (!%p255_p7)
}
  0x12   :  { %20 = dma.hbm_to_vmem [thread:$0]  %s383_s0, 128, %s18_s13, [#allocation3]  }
  0x13   :  { %s259_s28 = scalar_lea.hbm %s384_s1, 2048 }
  0x14   :  { %p260_p8 = scmp.ne.s32.totalorder %s384_s1, %s259_s28  ;;  %p263_p9 = scmp.lt.u32.totalorder %s259_s28, %s384_s1 }
  0x16   :  { %p265_p10 = pnand %p263_p9, %p260_p8 }
  0x18   :  { %268 = shalt.err (!%p265_p10)
}
  0x19   :  { %s269_s6 = scalar_lea.vmem %s337_s15, 2048  ;;  %p274_p12 = scmp.lt.s32.totalorder %s337_s15, %s337_s15 }
  0x1a   :  { %p270_p11 = scmp.ne.s32.totalorder %s337_s15, %s269_s6  ;;  %p275_p13 = scmp.lt.s32.totalorder %s269_s6, %s269_s6 }
  0x1c   :  { %p276_p0 = por %p275_p13, %p274_p12 }
  0x1e   :  { %p277_p1 = pnand %p276_p0, %p270_p11 }
  0x20   :  { %280 = shalt.err (!%p277_p1)
}
  0x21   :  { %s311_s0 = smov 128   ;;  %s312_s7 = smov 8  }
  0x22   :  { %32 = dma.hbm_to_vmem [thread:$0]  %s384_s1, 2048, %s337_s15, [#allocation6], %s311_s0, %s311_s0, %s312_s7  }
  0x23   :  { %303 = dma.done.wait [#allocation3], 128  }
  0x24   :  { %304 = vsyncadd [#allocation3], 4294967168 }
  0x25   :  { %305 = dma.done.wait [#allocation6], 2048  }
  0x26   :  { %306 = vsyncadd [#allocation6], 4294965248  ;;  %v313_v0 = vmov 0.0|0.0   ;;  %vm314_vm0 = vmmov 0   ;;  %v315_v1 = vmov 0.0   ;;  %v42_v2 = vld [vmem:[#allocation5] sm:$0xff] }
  0x27   :  { %205 = vmatprep.subr.bf16.mxu0 %v313_v0  ;;  %202 = vmatprep.mubr.msk.f32.mxu0 %vm314_vm0, %v315_v1  ;;  %v43_v3 = vld [vmem:[#allocation5 + $0x8] sm:$0xff]  ;;  %v44_v4 = vld [vmem:[#allocation5 + $0x10] sm:$0xff]  ;;  %v45_v6 = vld [vmem:[#allocation5 + $0x18] sm:$0xff]  ;;  %s316_s11 = smov [#allocation7]  }
  0x28   :  { %v206_v5 = vpack.c.bf16 %v43_v3, %v42_v2  ;;  %v209_v7 = vpack.c.bf16 %v45_v6, %v44_v4  ;;  %v46_v8 = vld [vmem:[#allocation5 + $0x20] sm:$0xff]  ;;  %v47_v9 = vld [vmem:[#allocation5 + $0x28] sm:$0xff]  ;;  %v48_v11 = vld [vmem:[#allocation5 + $0x30] sm:$0xff]  ;;  %s142_s12 = sshll.u32 %s316_s11, 4  ;;  %s143_s12 = int_to_ptr.vmem [resolvable:$true] %s142_s12 }
  0x29   :  { %v212_v10 = vpack.c.bf16 %v47_v9, %v46_v8  ;;  %v49_v12 = vld [vmem:[#allocation5 + $0x38] sm:$0xff]  ;;  %v50_v14 = vld [vmem:[#allocation5 + $0x40] sm:$0xff]  ;;  %v51_v15 = vld [vmem:[#allocation5 + $0x48] sm:$0xff]  ;;  %s281_s13 = scalar_lea.vmem %s143_s12, 128  ;;  %p286_p3 = scmp.lt.s32.totalorder %s143_s12, %s143_s12 }
  0x2a   :  { %207 = vmatpush3.bf16.msra.mxu0 %v206_v5  ;;  %v215_v13 = vpack.c.bf16 %v49_v12, %v48_v11  ;;  %v218_v16 = vpack.c.bf16 %v51_v15, %v50_v14  ;;  %v52_v17 = vld [vmem:[#allocation5 + $0x50] sm:$0xff]  ;;  %v53_v18 = vld [vmem:[#allocation5 + $0x58] sm:$0xff]  ;;  %v54_v20 = vld [vmem:[#allocation5 + $0x60] sm:$0xff]  ;;  %p282_p2 = scmp.ne.s32.totalorder %s143_s12, %s281_s13  ;;  %p287_p4 = scmp.lt.s32.totalorder %s281_s13, %s281_s13 }
  0x2b   :  { %208 = vmatprep.subr.bf16.mxu0 %v313_v0  ;;  %v221_v19 = vpack.c.bf16 %v53_v18, %v52_v17  ;;  %v55_v21 = vld [vmem:[#allocation5 + $0x68] sm:$0xff]  ;;  %v56_v23 = vld [vmem:[#allocation5 + $0x70] sm:$0xff]  ;;  %v57_v24 = vld [vmem:[#allocation5 + $0x78] sm:$0xff] }
  0x2c   :  { %v224_v22 = vpack.c.bf16 %v55_v21, %v54_v20  ;;  %v227_v25 = vpack.c.bf16 %v57_v24, %v56_v23  ;;  %v41_v26 = vld [vmem:[#allocation2] sm:$0xff]  ;;  %p288_p5 = por %p287_p4, %p286_p3 }
  0x2d   :  { %v152_v27 = vld [vmem:[%s385_s2] ss:$0 sm:$0xff] }
  0x2e   :  { %210 = vmatpush3.bf16.msra.mxu0 %v209_v7  ;;  %p289_p6 = pnand %p288_p5, %p282_p2 }
  0x2f   :  { %211 = vmatprep.subr.bf16.mxu0 %v313_v0 }
  0x32   :  { %213 = vmatpush3.bf16.msra.mxu0 %v212_v10 }
  0x33   :  { %214 = vmatprep.subr.bf16.mxu0 %v313_v0 }
  0x36   :  { %216 = vmatpush3.bf16.msra.mxu0 %v215_v13 }
  0x37   :  { %217 = vmatprep.subr.bf16.mxu0 %v313_v0 }
  0x3a   :  { %219 = vmatpush3.bf16.msra.mxu0 %v218_v16 }
  0x3b   :  { %220 = vmatprep.subr.bf16.mxu0 %v313_v0 }
  0x3e   :  { %222 = vmatpush3.bf16.msra.mxu0 %v221_v19 }
  0x3f   :  { %223 = vmatprep.subr.bf16.mxu0 %v313_v0 }
  0x42   :  { %225 = vmatpush3.bf16.msra.mxu0 %v224_v22 }
  0x43   :  { %226 = vmatprep.subr.bf16.mxu0 %v313_v0 }
  0x46   :  { %228 = vmatpush3.bf16.msra.mxu0 %v227_v25 }
  0x49   :  { %203 = vmatmul.mubr.f32.vlgmr.msra.gmra.mrb[0].mxu0 %v41_v26 }
 0x11c   :  { %v131_v28 = vpop.f32.mrb[0].mxu0 }
 0x11d   :  { %v132_v29 = vadd.f32 %v152_v27, %v131_v28  ;;  %v204_v30 = vpop.f32.mrb[1].mxu0 }
 0x11f   :  { %135 = vst [vmem:[#allocation7] sm:$0xff] %v132_v29 }
 0x120   :  { %292 = shalt.err (!%p289_p6)
}
 0x121   :  { %s293_s16 = scalar_lea.hbm %s386_s3, 128 }
 0x122   :  { %p294_p7 = scmp.ne.s32.totalorder %s386_s3, %s293_s16  ;;  %p297_p8 = scmp.lt.u32.totalorder %s293_s16, %s386_s3 }
 0x124   :  { %p299_p9 = pnand %p297_p8, %p294_p7 }
 0x126   :  { %302 = shalt.err (!%p299_p9)
}
 0x127   :  { %145 = dma.vmem_to_hbm [thread:$0]  %s143_s12, 128, %s386_s3, [#allocation4]  }
 0x128   :  { %307 = dma.done.wait [#allocation4], 128  }
 0x129   :  { %308 = vsyncadd [#allocation4], 4294967168 }
 0x12a   :  { %149 = vsyncpa [#allocation3], 1 }
 0x12b   :  { %150 = vsyncpa [#allocation6], 1 }
 0x12c   :  { %151 = vsyncpa [#allocation4], 1 }

</bundles_post_ra>
